<compile_context>
chip_gen: v7x
topology: tpu7x:2x2x1
jax: 0.10.0
libtpu: 0.0.40
codegen_flags: <defaults>
</compile_context>

<pallas_src>
import numpy as np
import jax
import jax.numpy as jnp
from jax.experimental import pallas as pl
from jax.experimental.pallas import tpu as pltpu


# ----------------------------- Pallas kernel --------------------------------
def mlp_kernel(xrep_ref,    # (4, TB, K)    pre-broadcast time strips, K = P*64
               wct_ref,     # (4, K)        tiled conv weights (rows 0..2) + conv bias (row 3)
               wfc1_ref,    # (K, 256)
               wfc2_ref,    # (256, 128)
               wtail_ref,   # (4, 128, 128) fc3..fc6 weights, zero-padded to 128x128
               bias_ref,    # (6, 256)      fc1..fc6 biases, zero-padded
               out_ref):    # (TB, 128)
    # ---- Conv1d(1, 64, k=3) + ReLU + MaxPool1d(2), already in flatten layout
    w0 = wct_ref[0:1, :]
    w1 = wct_ref[1:2, :]
    w2 = wct_ref[2:3, :]
    bc = wct_ref[3:4, :]

    x0 = xrep_ref[0]           # x[2p]     broadcast along channels  (TB, K)
    x1 = xrep_ref[1]           # x[2p + 1]
    x2 = xrep_ref[2]           # x[2p + 2]
    x3 = xrep_ref[3]           # x[2p + 3]

    conv_even = x0 * w0 + x1 * w1 + x2 * w2 + bc       # conv output at t = 2p
    conv_odd = x1 * w0 + x2 * w1 + x3 * w2 + bc        # conv output at t = 2p+1
    # relu(max(a, b)) == max(relu(a), relu(b))
    pooled = jnp.maximum(jnp.maximum(conv_even, conv_odd), 0.0)   # (TB, K)

    # ---- fc1: single K = P*64 MXU matmul (flatten fused via weight repack) --
    h = jnp.dot(pooled, wfc1_ref[...], preferred_element_type=jnp.float32)
    h = jnp.maximum(h + bias_ref[0:1, :], 0.0)                    # (TB, 256)

    # ---- fc2 ----
    h = jnp.dot(h, wfc2_ref[...], preferred_element_type=jnp.float32)
    h = jnp.maximum(h + bias_ref[1:2, 0:128], 0.0)                # (TB, 128)

    # ---- fc3..fc5 (+ReLU), fc6 (no ReLU); all kept 128-lane dense ----
    h = jnp.dot(h, wtail_ref[0], preferred_element_type=jnp.float32)
    h = jnp.maximum(h + bias_ref[2:3, 0:128], 0.0)                # fc3
    h = jnp.dot(h, wtail_ref[1], preferred_element_type=jnp.float32)
    h = jnp.maximum(h + bias_ref[3:4, 0:128], 0.0)                # fc4
    h = jnp.dot(h, wtail_ref[2], preferred_element_type=jnp.float32)
    h = jnp.maximum(h + bias_ref[4:5, 0:128], 0.0)                # fc5
    out = jnp.dot(h, wtail_ref[3], preferred_element_type=jnp.float32) \
        + bias_ref[5:6, 0:128]                                    # fc6 (no relu)

    out_ref[...] = out.astype(out_ref.dtype)


# ------------------------------ JAX wrapper ----------------------------------
def mlp_forward(x_ncl, params):
    """x_ncl: (B, 1, L) float32, same layout as the PyTorch module input."""
    B, C, L = x_ncl.shape
    assert C == 1
    T = L - 2                  # conv output length
    P = T // 2                 # pooled length
    assert P >= 1
    K = P * 64                 # flattened feature size

    # Batch padding / tiling: pad to a sublane multiple; grid over big batches.
    if B <= 128:
        TB = max(8, ((B + 7) // 8) * 8)
        B_pad = TB
    else:
        TB = 128
        B_pad = ((B + TB - 1) // TB) * TB
    grid = (B_pad // TB,)

    # ---- glue: pure data rearrangement (slicing / broadcast / transpose) ----
    x2 = x_ncl[:, 0, :].astype(jnp.float32)                       # (B, L)
    if B_pad != B:
        x2 = jnp.pad(x2, ((0, B_pad - B), (0, 0)))
    # Four time strips x[2p+k], each broadcast 64x along lanes so the conv
    # output lands directly in the flatten layout index p*64 + c.
    strips = jnp.stack([x2[:, k:k + 2 * P:2] for k in range(4)], axis=0)  # (4,Bp,P)
    xrep = jnp.repeat(strips, 64, axis=-1)                                # (4,Bp,K)

    # Conv weight tile slab: wct[k, p*64+c] = conv_w[c, k]; row 3 = bias.
    conv_w, conv_b = params["conv_w"], params["conv_b"]           # (64,3), (64,)
    wct = jnp.stack([jnp.tile(conv_w[:, 0], P),
                     jnp.tile(conv_w[:, 1], P),
                     jnp.tile(conv_w[:, 2], P),
                     jnp.tile(conv_b, P)], axis=0)                # (4, K)

    # fc1 weight: torch flatten is channel-major (c*P + p); kernel flatten is
    # p-major (p*64 + c).  Permute once so a single matmul reproduces torch.
    wfc1 = params["W1"].T.reshape(64, P, 256).transpose(1, 0, 2).reshape(K, 256)
    wfc2 = params["W2"].T                                         # (256, 128)

    def pad_w(w_torch):        # torch (out, in) -> (in, out), zero-pad to 128x128
        w = w_torch.T
        return jnp.pad(w, ((0, 128 - w.shape[0]), (0, 128 - w.shape[1])))

    wtail = jnp.stack([pad_w(params["W3"]), pad_w(params["W4"]),
                       pad_w(params["W5"]), pad_w(params["W6"])], axis=0)  # (4,128,128)

    def pad_b(b):
        return jnp.pad(b, (0, 256 - b.shape[0]))

    bias_slab = jnp.stack([pad_b(params["b1"]), pad_b(params["b2"]),
                           pad_b(params["b3"]), pad_b(params["b4"]),
                           pad_b(params["b5"]), pad_b(params["b6"])], axis=0)  # (6,256)

    out = pl.pallas_call(
        mlp_kernel,
        out_shape=jax.ShapeDtypeStruct((B_pad, 128), jnp.float32),
        grid=grid,
        in_specs=[
            pl.BlockSpec((4, TB, K), lambda i: (0, i, 0)),        # x strips (batch-tiled)
            pl.BlockSpec((4, K), lambda i: (0, 0)),               # conv weight tile
            pl.BlockSpec((K, 256), lambda i: (0, 0)),             # fc1 W
            pl.BlockSpec((256, 128), lambda i: (0, 0)),           # fc2 W
            pl.BlockSpec((4, 128, 128), lambda i: (0, 0, 0)),     # fc3..fc6 W slab
            pl.BlockSpec((6, 256), lambda i: (0, 0)),             # bias slab
        ],
        out_specs=pl.BlockSpec((TB, 128), lambda i: (i, 0)),
        compiler_params=pltpu.CompilerParams(
            dimension_semantics=("parallel",)),
    )(xrep, wct, wfc1, wfc2, wtail, bias_slab)

    return out[:B, :6]


# --------------------------- Pure-JAX reference ------------------------------
def mlp_reference(x_ncl, params):
    """Bit-for-bit PyTorch semantics (NCL conv, channel-major flatten)."""
    B, _, L = x_ncl.shape
    T, P = L - 2, (L - 2) // 2
    x2 = x_ncl[:, 0, :]
    cols = jnp.stack([x2[:, k:k + T] for k in range(3)], axis=-1)         # (B,T,3)
    conv = jnp.einsum("btk,ck->bct", cols, params["conv_w"]) \
        + params["conv_b"][None, :, None]                                 # (B,64,T)
    conv = jax.nn.relu(conv)
    pooled = conv[:, :, :2 * P].reshape(B, 64, P, 2).max(axis=-1)         # (B,64,P)
    h = pooled.reshape(B, 64 * P)                                         # channel-major
    h = jax.nn.relu(h @ params["W1"].T + params["b1"])
    h = jax.nn.relu(h @ params["W2"].T + params["b2"])
    h = jax.nn.relu(h @ params["W3"].T + params["b3"])
    h = jax.nn.relu(h @ params["W4"].T + params["b4"])
    h = jax.nn.relu(h @ params["W5"].T + params["b5"])
    return h @ params["W6"].T + params["b6"]


# --------------------------------- main ---------------------------------------
if __name__ == "__main__":
    B = 4
    INPUT_SIZE = 18                      # L; flatten dim = 64 * ((18-2)//2) = 512
    key = jax.random.PRNGKey(0)
    ks = jax.random.split(key, 16)

    def init(k, shape, scale=0.1):
        return scale * jax.random.normal(k, shape, dtype=jnp.float32)

    flat = 64 * ((INPUT_SIZE - 2) // 2)
    params = {
        "conv_w": init(ks[0], (64, 3)),   "conv_b": init(ks[1], (64,)),
        "W1": init(ks[2], (256, flat)),   "b1": init(ks[3], (256,)),
        "W2": init(ks[4], (128, 256)),    "b2": init(ks[5], (128,)),
        "W3": init(ks[6], (64, 128)),     "b3": init(ks[7], (64,)),
        "W4": init(ks[8], (32, 64)),      "b4": init(ks[9], (32,)),
        "W5": init(ks[10], (16, 32)),     "b5": init(ks[11], (16,)),
        "W6": init(ks[12], (6, 16)),      "b6": init(ks[13], (6,)),
    }

    x = jax.random.normal(ks[14], (B, 1, INPUT_SIZE), dtype=jnp.float32)

    out = mlp_forward(x, params)
    out = jax.block_until_ready(out)

    ref = mlp_reference(x, params)
    np.testing.assert_allclose(np.asarray(out), np.asarray(ref),
                               rtol=1e-4, atol=1e-4)
    print("KERNEL_OK")
</pallas_src>

<mosaic_0001>
module attributes {stable_mosaic.version = 11 : i64} {
  func.func @mlp_kernel(%arg0: i32, %arg1: memref<4x8x512xf32, #tpu.memory_space<vmem>>, %arg2: memref<4x512xf32, #tpu.memory_space<vmem>>, %arg3: memref<512x256xf32, #tpu.memory_space<vmem>>, %arg4: memref<256x128xf32, #tpu.memory_space<vmem>>, %arg5: memref<4x128x128xf32, #tpu.memory_space<vmem>>, %arg6: memref<6x256xf32, #tpu.memory_space<vmem>>, %arg7: memref<8x128xf32, #tpu.memory_space<vmem>>) attributes {dimension_semantics = [#tpu.dimension_semantics<parallel>], iteration_bounds = array<i64: 1>, scalar_prefetch = 0 : i64, scratch_operands = 0 : i64, tpu.core_type = #tpu.core_type<tc>, window_params = [{transform_indices = @transform_0, window_bounds = array<i64: 4, 8, 512>}, {pipeline_mode = #tpu.pipeline_mode<synchronous>, transform_indices = @transform_1, window_bounds = array<i64: 4, 512>}, {pipeline_mode = #tpu.pipeline_mode<synchronous>, transform_indices = @transform_2, window_bounds = array<i64: 512, 256>}, {pipeline_mode = #tpu.pipeline_mode<synchronous>, transform_indices = @transform_3, window_bounds = array<i64: 256, 128>}, {pipeline_mode = #tpu.pipeline_mode<synchronous>, transform_indices = @transform_4, window_bounds = array<i64: 4, 128, 128>}, {pipeline_mode = #tpu.pipeline_mode<synchronous>, transform_indices = @transform_5, window_bounds = array<i64: 6, 256>}, {transform_indices = @transform_6, window_bounds = array<i64: 8, 128>}]} {
    %c0 = arith.constant 0 : index
    %c0_0 = arith.constant 0 : index
    %0 = vector.load %arg2[%c0, %c0_0] : memref<4x512xf32, #tpu.memory_space<vmem>>, vector<1x512xf32>
    %c1 = arith.constant 1 : index
    %c0_1 = arith.constant 0 : index
    %1 = vector.load %arg2[%c1, %c0_1] : memref<4x512xf32, #tpu.memory_space<vmem>>, vector<1x512xf32>
    %c2 = arith.constant 2 : index
    %c0_2 = arith.constant 0 : index
    %2 = vector.load %arg2[%c2, %c0_2] : memref<4x512xf32, #tpu.memory_space<vmem>>, vector<1x512xf32>
    %c3 = arith.constant 3 : index
    %c0_3 = arith.constant 0 : index
    %3 = vector.load %arg2[%c3, %c0_3] : memref<4x512xf32, #tpu.memory_space<vmem>>, vector<1x512xf32>
    %c0_4 = arith.constant 0 : index
    %c0_5 = arith.constant 0 : index
    %c0_6 = arith.constant 0 : index
    %4 = vector.load %arg1[%c0_4, %c0_5, %c0_6] : memref<4x8x512xf32, #tpu.memory_space<vmem>>, vector<1x8x512xf32>
    %5 = vector.shape_cast %4 : vector<1x8x512xf32> to vector<8x512xf32>
    %c1_7 = arith.constant 1 : index
    %c0_8 = arith.constant 0 : index
    %c0_9 = arith.constant 0 : index
    %6 = vector.load %arg1[%c1_7, %c0_8, %c0_9] : memref<4x8x512xf32, #tpu.memory_space<vmem>>, vector<1x8x512xf32>
    %7 = vector.shape_cast %6 : vector<1x8x512xf32> to vector<8x512xf32>
    %c2_10 = arith.constant 2 : index
    %c0_11 = arith.constant 0 : index
    %c0_12 = arith.constant 0 : index
    %8 = vector.load %arg1[%c2_10, %c0_11, %c0_12] : memref<4x8x512xf32, #tpu.memory_space<vmem>>, vector<1x8x512xf32>
    %9 = vector.shape_cast %8 : vector<1x8x512xf32> to vector<8x512xf32>
    %c3_13 = arith.constant 3 : index
    %c0_14 = arith.constant 0 : index
    %c0_15 = arith.constant 0 : index
    %10 = vector.load %arg1[%c3_13, %c0_14, %c0_15] : memref<4x8x512xf32, #tpu.memory_space<vmem>>, vector<1x8x512xf32>
    %11 = vector.shape_cast %10 : vector<1x8x512xf32> to vector<8x512xf32>
    %12 = vector.broadcast %0 : vector<1x512xf32> to vector<8x512xf32>
    %13 = arith.mulf %5, %12 : vector<8x512xf32>
    %14 = vector.broadcast %1 : vector<1x512xf32> to vector<8x512xf32>
    %15 = arith.mulf %7, %14 : vector<8x512xf32>
    %16 = arith.addf %13, %15 : vector<8x512xf32>
    %17 = vector.broadcast %2 : vector<1x512xf32> to vector<8x512xf32>
    %18 = arith.mulf %9, %17 : vector<8x512xf32>
    %19 = arith.addf %16, %18 : vector<8x512xf32>
    %20 = vector.broadcast %3 : vector<1x512xf32> to vector<8x512xf32>
    %21 = arith.addf %19, %20 : vector<8x512xf32>
    %22 = vector.broadcast %0 : vector<1x512xf32> to vector<8x512xf32>
    %23 = arith.mulf %7, %22 : vector<8x512xf32>
    %24 = vector.broadcast %1 : vector<1x512xf32> to vector<8x512xf32>
    %25 = arith.mulf %9, %24 : vector<8x512xf32>
    %26 = arith.addf %23, %25 : vector<8x512xf32>
    %27 = vector.broadcast %2 : vector<1x512xf32> to vector<8x512xf32>
    %28 = arith.mulf %11, %27 : vector<8x512xf32>
    %29 = arith.addf %26, %28 : vector<8x512xf32>
    %30 = vector.broadcast %3 : vector<1x512xf32> to vector<8x512xf32>
    %31 = arith.addf %29, %30 : vector<8x512xf32>
    %32 = arith.maximumf %21, %31 : vector<8x512xf32>
    %cst = arith.constant 0.000000e+00 : f32
    %33 = vector.broadcast %cst : f32 to vector<8x512xf32>
    %34 = arith.maximumf %32, %33 : vector<8x512xf32>
    %c0_16 = arith.constant 0 : index
    %c0_17 = arith.constant 0 : index
    %35 = vector.load %arg3[%c0_16, %c0_17] : memref<512x256xf32, #tpu.memory_space<vmem>>, vector<512x256xf32>
    %cst_18 = arith.constant dense<0.000000e+00> : vector<8x256xf32>
    %36 = tpu.matmul %34, %35, %cst_18 {dimension_numbers = #tpu.dot_dimension_numbers<[1], [0], [0], [1], [0, 0, 1, 1], [], []>} : vector<8x512xf32>, vector<512x256xf32>, vector<8x256xf32> -> vector<8x256xf32>
    %c0_19 = arith.constant 0 : index
    %c0_20 = arith.constant 0 : index
    %37 = vector.load %arg6[%c0_19, %c0_20] : memref<6x256xf32, #tpu.memory_space<vmem>>, vector<1x256xf32>
    %38 = vector.broadcast %37 : vector<1x256xf32> to vector<8x256xf32>
    %39 = arith.addf %36, %38 : vector<8x256xf32>
    %cst_21 = arith.constant 0.000000e+00 : f32
    %40 = vector.broadcast %cst_21 : f32 to vector<8x256xf32>
    %41 = arith.maximumf %39, %40 : vector<8x256xf32>
    %c0_22 = arith.constant 0 : index
    %c0_23 = arith.constant 0 : index
    %42 = vector.load %arg4[%c0_22, %c0_23] : memref<256x128xf32, #tpu.memory_space<vmem>>, vector<256x128xf32>
    %cst_24 = arith.constant dense<0.000000e+00> : vector<8x128xf32>
    %43 = tpu.matmul %41, %42, %cst_24 {dimension_numbers = #tpu.dot_dimension_numbers<[1], [0], [0], [1], [0, 0, 1, 1], [], []>} : vector<8x256xf32>, vector<256x128xf32>, vector<8x128xf32> -> vector<8x128xf32>
    %c1_25 = arith.constant 1 : index
    %c0_26 = arith.constant 0 : index
    %44 = vector.load %arg6[%c1_25, %c0_26] : memref<6x256xf32, #tpu.memory_space<vmem>>, vector<1x128xf32>
    %45 = vector.broadcast %44 : vector<1x128xf32> to vector<8x128xf32>
    %46 = arith.addf %43, %45 : vector<8x128xf32>
    %cst_27 = arith.constant 0.000000e+00 : f32
    %47 = vector.broadcast %cst_27 : f32 to vector<8x128xf32>
    %48 = arith.maximumf %46, %47 : vector<8x128xf32>
    %c0_28 = arith.constant 0 : index
    %c0_29 = arith.constant 0 : index
    %c0_30 = arith.constant 0 : index
    %49 = vector.load %arg5[%c0_28, %c0_29, %c0_30] : memref<4x128x128xf32, #tpu.memory_space<vmem>>, vector<1x128x128xf32>
    %50 = vector.shape_cast %49 : vector<1x128x128xf32> to vector<128x128xf32>
    %cst_31 = arith.constant dense<0.000000e+00> : vector<8x128xf32>
    %51 = tpu.matmul %48, %50, %cst_31 {dimension_numbers = #tpu.dot_dimension_numbers<[1], [0], [0], [1], [0, 0, 1, 1], [], []>} : vector<8x128xf32>, vector<128x128xf32>, vector<8x128xf32> -> vector<8x128xf32>
    %c2_32 = arith.constant 2 : index
    %c0_33 = arith.constant 0 : index
    %52 = vector.load %arg6[%c2_32, %c0_33] : memref<6x256xf32, #tpu.memory_space<vmem>>, vector<1x128xf32>
    %53 = vector.broadcast %52 : vector<1x128xf32> to vector<8x128xf32>
    %54 = arith.addf %51, %53 : vector<8x128xf32>
    %cst_34 = arith.constant 0.000000e+00 : f32
    %55 = vector.broadcast %cst_34 : f32 to vector<8x128xf32>
    %56 = arith.maximumf %54, %55 : vector<8x128xf32>
    %c1_35 = arith.constant 1 : index
    %c0_36 = arith.constant 0 : index
    %c0_37 = arith.constant 0 : index
    %57 = vector.load %arg5[%c1_35, %c0_36, %c0_37] : memref<4x128x128xf32, #tpu.memory_space<vmem>>, vector<1x128x128xf32>
    %58 = vector.shape_cast %57 : vector<1x128x128xf32> to vector<128x128xf32>
    %cst_38 = arith.constant dense<0.000000e+00> : vector<8x128xf32>
    %59 = tpu.matmul %56, %58, %cst_38 {dimension_numbers = #tpu.dot_dimension_numbers<[1], [0], [0], [1], [0, 0, 1, 1], [], []>} : vector<8x128xf32>, vector<128x128xf32>, vector<8x128xf32> -> vector<8x128xf32>
    %c3_39 = arith.constant 3 : index
    %c0_40 = arith.constant 0 : index
    %60 = vector.load %arg6[%c3_39, %c0_40] : memref<6x256xf32, #tpu.memory_space<vmem>>, vector<1x128xf32>
    %61 = vector.broadcast %60 : vector<1x128xf32> to vector<8x128xf32>
    %62 = arith.addf %59, %61 : vector<8x128xf32>
    %cst_41 = arith.constant 0.000000e+00 : f32
    %63 = vector.broadcast %cst_41 : f32 to vector<8x128xf32>
    %64 = arith.maximumf %62, %63 : vector<8x128xf32>
    %c2_42 = arith.constant 2 : index
    %c0_43 = arith.constant 0 : index
    %c0_44 = arith.constant 0 : index
    %65 = vector.load %arg5[%c2_42, %c0_43, %c0_44] : memref<4x128x128xf32, #tpu.memory_space<vmem>>, vector<1x128x128xf32>
    %66 = vector.shape_cast %65 : vector<1x128x128xf32> to vector<128x128xf32>
    %cst_45 = arith.constant dense<0.000000e+00> : vector<8x128xf32>
    %67 = tpu.matmul %64, %66, %cst_45 {dimension_numbers = #tpu.dot_dimension_numbers<[1], [0], [0], [1], [0, 0, 1, 1], [], []>} : vector<8x128xf32>, vector<128x128xf32>, vector<8x128xf32> -> vector<8x128xf32>
    %c4 = arith.constant 4 : index
    %c0_46 = arith.constant 0 : index
    %68 = vector.load %arg6[%c4, %c0_46] : memref<6x256xf32, #tpu.memory_space<vmem>>, vector<1x128xf32>
    %69 = vector.broadcast %68 : vector<1x128xf32> to vector<8x128xf32>
    %70 = arith.addf %67, %69 : vector<8x128xf32>
    %cst_47 = arith.constant 0.000000e+00 : f32
    %71 = vector.broadcast %cst_47 : f32 to vector<8x128xf32>
    %72 = arith.maximumf %70, %71 : vector<8x128xf32>
    %c3_48 = arith.constant 3 : index
    %c0_49 = arith.constant 0 : index
    %c0_50 = arith.constant 0 : index
    %73 = vector.load %arg5[%c3_48, %c0_49, %c0_50] : memref<4x128x128xf32, #tpu.memory_space<vmem>>, vector<1x128x128xf32>
    %74 = vector.shape_cast %73 : vector<1x128x128xf32> to vector<128x128xf32>
    %cst_51 = arith.constant dense<0.000000e+00> : vector<8x128xf32>
    %75 = tpu.matmul %72, %74, %cst_51 {dimension_numbers = #tpu.dot_dimension_numbers<[1], [0], [0], [1], [0, 0, 1, 1], [], []>} : vector<8x128xf32>, vector<128x128xf32>, vector<8x128xf32> -> vector<8x128xf32>
    %c5 = arith.constant 5 : index
    %c0_52 = arith.constant 0 : index
    %76 = vector.load %arg6[%c5, %c0_52] : memref<6x256xf32, #tpu.memory_space<vmem>>, vector<1x128xf32>
    %77 = vector.broadcast %76 : vector<1x128xf32> to vector<8x128xf32>
    %78 = arith.addf %75, %77 : vector<8x128xf32>
    %c0_53 = arith.constant 0 : index
    %c0_54 = arith.constant 0 : index
    %79 = vector.load %arg7[%c0_53, %c0_54] : memref<8x128xf32, #tpu.memory_space<vmem>>, vector<8x128xf32>
    tpu.vector_store %arg7[%c0_53, %c0_54], %78 {strides = array<i32>} : memref<8x128xf32, #tpu.memory_space<vmem>>, vector<8x128xf32>,
    return
  }
  func.func @transform_0(%arg0: i32) -> (i32, i32, i32) {
    %c0_i32 = arith.constant 0 : i32
    %c0_i32_0 = arith.constant 0 : i32
    %c0_i32_1 = arith.constant 0 : i32
    return %c0_i32, %arg0, %c0_i32_0 : i32, i32, i32
  }
  func.func @transform_1(%arg0: i32) -> (i32, i32) {
    %c0_i32 = arith.constant 0 : i32
    %c0_i32_0 = arith.constant 0 : i32
    %c0_i32_1 = arith.constant 0 : i32
    return %c0_i32, %c0_i32_0 : i32, i32
  }
  func.func @transform_2(%arg0: i32) -> (i32, i32) {
    %c0_i32 = arith.constant 0 : i32
    %c0_i32_0 = arith.constant 0 : i32
    %c0_i32_1 = arith.constant 0 : i32
    return %c0_i32, %c0_i32_0 : i32, i32
  }
  func.func @transform_3(%arg0: i32) -> (i32, i32) {
    %c0_i32 = arith.constant 0 : i32
    %c0_i32_0 = arith.constant 0 : i32
    %c0_i32_1 = arith.constant 0 : i32
    return %c0_i32, %c0_i32_0 : i32, i32
  }
  func.func @transform_4(%arg0: i32) -> (i32, i32, i32) {
    %c0_i32 = arith.constant 0 : i32
    %c0_i32_0 = arith.constant 0 : i32
    %c0_i32_1 = arith.constant 0 : i32
    %c0_i32_2 = arith.constant 0 : i32
    return %c0_i32, %c0_i32_0, %c0_i32_1 : i32, i32, i32
  }
  func.func @transform_5(%arg0: i32) -> (i32, i32) {
    %c0_i32 = arith.constant 0 : i32
    %c0_i32_0 = arith.constant 0 : i32
    %c0_i32_1 = arith.constant 0 : i32
    return %c0_i32, %c0_i32_0 : i32, i32
  }
  func.func @transform_6(%arg0: i32) -> (i32, i32) {
    %c0_i32 = arith.constant 0 : i32
    %c0_i32_0 = arith.constant 0 : i32
    return %arg0, %c0_i32 : i32, i32
  }
}

</mosaic_0001>

<bundles_post_ra>
// kernel: tpu_custom_call.1
= control target key start
LH: loop header
LB: loop body
LE: loop exit
PB: predicated region body
PF: predicated region fallthrough
CT: control target
= control target key end

     0   :  { %11 = vsyncpa [#allocation3], 0  ;;  %s1961_s0 = inlined_call_operand.hbm [shape: f32[4,8,512], index: 0, kind: input, shape index: {}]   ;;  %s1962_s1 = inlined_call_operand.hbm [shape: f32[4,512], index: 1, kind: input, shape index: {}]   ;;  %s1963_s2 = inlined_call_operand.hbm [shape: f32[512,256], index: 2, kind: input, shape index: {}]   ;;  %s1964_s3 = inlined_call_operand.hbm [shape: f32[256,128], index: 3, kind: input, shape index: {}]   ;;  %s1965_s4 = inlined_call_operand.hbm [shape: f32[4,128,128], index: 4, kind: input, shape index: {}]   ;;  %s1966_s5 = inlined_call_operand.vmem [shape: f32[6,256], index: 5, kind: input, shape index: {}]   ;;  %s1967_s6 = inlined_call_operand.hbm [shape: f32[8,128], index: 6, kind: output, shape index: {}]  }
   0x1   :  { %12 = vsyncpa [#allocation6], 0 }
   0x2   :  { %13 = vsyncpa [#allocation9], 0 }
   0x3   :  { %14 = vsyncpa [#allocation4], 0  ;;  %s1674_s21 = smov [#allocation5]   ;;  %s1675_s23 = smov [#allocation8]  }
   0x4   :  { %s33_s22 = sshll.u32 %s1674_s21, 4  ;;  %s54_s24 = sshll.u32 %s1675_s23, 4  ;;  %s34_s22 = int_to_ptr.vmem [resolvable:$true] %s33_s22  ;;  %s1724_s24 = int_to_ptr.vmem [resolvable:$true] %s54_s24 }
   0x5   :  { %s1534_s27 = scalar_lea.hbm %s1962_s1, 256 }
   0x6   :  { %p1535_p0 = scmp.ne.s32.totalorder %s1962_s1, %s1534_s27  ;;  %p1538_p1 = scmp.lt.u32.totalorder %s1534_s27, %s1962_s1 }
   0x8   :  { %p1540_p2 = pnand %p1538_p1, %p1535_p0 }
   0xa   :  { %1543 = shalt.err (!%p1540_p2)
}
   0xb   :  { %s1544_s8 = scalar_lea.vmem %s34_s22, 256  ;;  %p1549_p4 = scmp.lt.s32.totalorder %s34_s22, %s34_s22 }
   0xc   :  { %p1545_p3 = scmp.ne.s32.totalorder %s34_s22, %s1544_s8  ;;  %p1550_p5 = scmp.lt.s32.totalorder %s1544_s8, %s1544_s8 }
   0xe   :  { %p1551_p6 = por %p1550_p5, %p1549_p4 }
  0x10   :  { %p1552_p7 = pnand %p1551_p6, %p1545_p3 }
  0x12   :  { %1555 = shalt.err (!%p1552_p7)
}
  0x13   :  { %36 = dma.hbm_to_vmem [thread:$0]  %s1962_s1, 256, %s34_s22, [#allocation6]  }
  0x14   :  { %s1556_s13 = scalar_lea.hbm %s1964_s3, 4096 }
  0x15   :  { %p1557_p8 = scmp.ne.s32.totalorder %s1964_s3, %s1556_s13  ;;  %p1560_p9 = scmp.lt.u32.totalorder %s1556_s13, %s1964_s3 }
  0x17   :  { %p1562_p10 = pnand %p1560_p9, %p1557_p8 }
  0x19   :  { %1565 = shalt.err (!%p1562_p10)
}
  0x1a   :  { %s1566_s18 = scalar_lea.vmem %s1724_s24, 4096  ;;  %p1571_p12 = scmp.lt.s32.totalorder %s1724_s24, %s1724_s24 }
  0x1b   :  { %p1567_p11 = scmp.ne.s32.totalorder %s1724_s24, %s1566_s18  ;;  %p1572_p13 = scmp.lt.s32.totalorder %s1566_s18, %s1566_s18 }
  0x1d   :  { %p1573_p0 = por %p1572_p13, %p1571_p12 }
  0x1f   :  { %p1574_p1 = pnand %p1573_p0, %p1567_p11 }
  0x21   :  { %1577 = shalt.err (!%p1574_p1)
}
  0x22   :  { %s1676_s1 = smov 128   ;;  %s1677_s19 = smov 8  }
  0x23   :  { %60 = dma.hbm_to_vmem [thread:$0]  %s1964_s3, 4096, %s1724_s24, [#allocation9], %s1676_s1, %s1676_s1, %s1677_s19  }
  0x24   :  { %s1678_s22 = smov [#allocation2]   ;;  %s1578_s27 = scalar_lea.hbm %s1961_s0, 2048 }
  0x25   :  { %s20_s23 = sshll.u32 %s1678_s22, 4  ;;  %p1579_p2 = scmp.ne.s32.totalorder %s1961_s0, %s1578_s27  ;;  %s21_s23 = int_to_ptr.vmem [resolvable:$true] %s20_s23 }
  0x26   :  { %p1582_p3 = scmp.lt.u32.totalorder %s1578_s27, %s1961_s0 }
  0x28   :  { %p1584_p4 = pnand %p1582_p3, %p1579_p2 }
  0x2a   :  { %1587 = shalt.err (!%p1584_p4)
}
  0x2b   :  { %s1588_s8 = scalar_lea.vmem %s21_s23, 2048  ;;  %p1593_p6 = scmp.lt.s32.totalorder %s21_s23, %s21_s23 }
  0x2c   :  { %p1589_p5 = scmp.ne.s32.totalorder %s21_s23, %s1588_s8  ;;  %p1594_p7 = scmp.lt.s32.totalorder %s1588_s8, %s1588_s8 }
  0x2e   :  { %p1595_p8 = por %p1594_p7, %p1593_p6 }
  0x30   :  { %p1596_p9 = pnand %p1595_p8, %p1589_p5 }
  0x32   :  { %1599 = shalt.err (!%p1596_p9)
}
  0x33   :  { %s1679_s3 = smov 512   ;;  %s1680_s24 = smov 32  }
  0x34   :  { %26 = dma.hbm_to_vmem [thread:$0]  %s1961_s0, 2048, %s21_s23, [#allocation3], %s1679_s3, %s1679_s3, %s1680_s24  }
  0x35   :  { %s1681_s11 = smov [#allocation7]   ;;  %s1600_s15 = scalar_lea.hbm %s1963_s2, 16384 }
  0x36   :  { %s42_s12 = sshll.u32 %s1681_s11, 4  ;;  %p1601_p10 = scmp.ne.s32.totalorder %s1963_s2, %s1600_s15  ;;  %s43_s12 = int_to_ptr.vmem [resolvable:$true] %s42_s12 }
  0x37   :  { %p1604_p11 = scmp.lt.u32.totalorder %s1600_s15, %s1963_s2 }
  0x39   :  { %p1606_p12 = pnand %p1604_p11, %p1601_p10 }
  0x3b   :  { %1609 = shalt.err (!%p1606_p12)
}
  0x3c   :  { %s1610_s21 = scalar_lea.vmem %s43_s12, 16384  ;;  %p1615_p0 = scmp.lt.s32.totalorder %s43_s12, %s43_s12 }
  0x3d   :  { %p1611_p13 = scmp.ne.s32.totalorder %s43_s12, %s1610_s21  ;;  %p1616_p1 = scmp.lt.s32.totalorder %s1610_s21, %s1610_s21 }
  0x3f   :  { %p1617_p2 = por %p1616_p1, %p1615_p0 }
  0x41   :  { %p1618_p3 = pnand %p1617_p2, %p1611_p13 }
  0x43   :  { %1621 = shalt.err (!%p1618_p3)
}
  0x44   :  { %s1682_s0 = smov 256   ;;  %s1683_s22 = smov 16  }
  0x45   :  { %48 = dma.hbm_to_vmem [thread:$0]  %s1963_s2, 16384, %s43_s12, [#allocation6], %s1682_s0, %s1682_s0, %s1683_s22  }
  0x46   :  { %s1684_s26 = smov [#allocation10]   ;;  %s1622_s30 = scalar_lea.hbm %s1965_s4, 8192 }
  0x47   :  { %s66_s27 = sshll.u32 %s1684_s26, 4  ;;  %p1623_p4 = scmp.ne.s32.totalorder %s1965_s4, %s1622_s30  ;;  %s67_s27 = int_to_ptr.vmem [resolvable:$true] %s66_s27 }
  0x48   :  { %p1626_p5 = scmp.lt.u32.totalorder %s1622_s30, %s1965_s4 }
  0x4a   :  { %p1628_p6 = pnand %p1626_p5, %p1623_p4 }
  0x4c   :  { %1631 = shalt.err (!%p1628_p6)
}
  0x4d   :  { %s1632_s9 = scalar_lea.vmem %s67_s27, 8192  ;;  %p1637_p8 = scmp.lt.s32.totalorder %s67_s27, %s67_s27 }
  0x4e   :  { %p1633_p7 = scmp.ne.s32.totalorder %s67_s27, %s1632_s9  ;;  %p1638_p9 = scmp.lt.s32.totalorder %s1632_s9, %s1632_s9 }
  0x50   :  { %p1639_p10 = por %p1638_p9, %p1637_p8 }
  0x52   :  { %p1640_p11 = pnand %p1639_p10, %p1633_p7 }
  0x54   :  { %1643 = shalt.err (!%p1640_p11)
}
  0x55   :  { %72 = dma.hbm_to_vmem [thread:$0]  %s1965_s4, 8192, %s67_s27, [#allocation9], %s1676_s1, %s1676_s1, %s1677_s19  }
  0x56   :  { %1666 = dma.done.wait [#allocation3], 2048  }
  0x57   :  { %1667 = vsyncadd [#allocation3], 4294965248 }
  0x58   :  { %1668 = dma.done.wait [#allocation6], 16640  }
  0x59   :  { %1669 = vsyncadd [#allocation6], 4294950656 }
  0x5a   :  { %1670 = dma.done.wait [#allocation9], 12288  }
  0x5b   :  { %1671 = vsyncadd [#allocation9], 4294955008  ;;  %v257_v0 = vld [vmem:[#allocation7 + $0x8] sm:$0xff]  ;;  %v259_v1 = vld [vmem:[#allocation7 + $0x18] sm:$0xff]  ;;  %v117_v25 = vlaneseq  ;;  %vm1686_vm0 = vmmov 0   ;;  %s1688_s21 = smov [#allocation11]  }
  0x5c   :  { %v256_v2 = vld [vmem:[#allocation7] sm:$0xff]  ;;  %v1259_v3 = vpack.c.bf16 %v259_v1, %v257_v0  ;;  %v258_v4 = vld [vmem:[#allocation7 + $0x10] sm:$0xff]  ;;  %v261_v5 = vld [vmem:[#allocation7 + $0x28] sm:$0xff]  ;;  %s1005_s0 = sshll.u32 %s1688_s21, 4  ;;  %s1006_s0 = int_to_ptr.vmem [resolvable:$true] %s1005_s0 }
  0x5d   :  { %v263_v6 = vld [vmem:[#allocation7 + $0x38] sm:$0xff]  ;;  %v1261_v7 = vpack.c.bf16 %v258_v4, %v256_v2  ;;  %v260_v9 = vld [vmem:[#allocation7 + $0x20] sm:$0xff]  ;;  %v262_v10 = vld [vmem:[#allocation7 + $0x30] sm:$0xff]  ;;  %v1797_v32 = vshrl.u32 %v117_v25, 7  ;;  %s1644_s22 = scalar_lea.vmem %s1006_s0, 128  ;;  %p1649_p13 = scmp.lt.s32.totalorder %s1006_s0, %s1006_s0 }
  0x5e   :  { %v1263_v8 = vpack.c.bf16 %v263_v6, %v261_v5  ;;  %v265_v11 = vld [vmem:[#allocation7 + $0x48] sm:$0xff]  ;;  %1260 = vmatprep.subr.bf16.mxu0 %v1259_v3  ;;  %v267_v12 = vld [vmem:[#allocation7 + $0x58] sm:$0xff]  ;;  %v1265_v13 = vpack.c.bf16 %v262_v10, %v260_v9  ;;  %v264_v15 = vld [vmem:[#allocation7 + $0x40] sm:$0xff]  ;;  %p1645_p12 = scmp.ne.s32.totalorder %s1006_s0, %s1644_s22  ;;  %p1650_p0 = scmp.lt.s32.totalorder %s1644_s22, %s1644_s22 }
  0x5f   :  { %1262 = vmatpush1.bf16.msra.mxu0 %v1261_v7  ;;  %v1267_v14 = vpack.c.bf16 %v267_v12, %v265_v11  ;;  %v266_v16 = vld [vmem:[#allocation7 + $0x50] sm:$0xff]  ;;  %v269_v17 = vld [vmem:[#allocation7 + $0x68] sm:$0xff]  ;;  %v271_v18 = vld [vmem:[#allocation7 + $0x78] sm:$0xff]  ;;  %v1800_v39 = vsub.s32 1, %v1797_v32 }
  0x60   :  { %1264 = vmatprep.subr.bf16.mxu0 %v1263_v8  ;;  %v1269_v19 = vpack.c.bf16 %v266_v16, %v264_v15  ;;  %v1271_v20 = vpack.c.bf16 %v271_v18, %v269_v17  ;;  %v268_v21 = vld [vmem:[#allocation7 + $0x60] sm:$0xff]  ;;  %v270_v22 = vld [vmem:[#allocation7 + $0x70] sm:$0xff]  ;;  %v273_v23 = vld [vmem:[#allocation7 + $0x88] sm:$0xff]  ;;  %v127_v16 = vsub.s32 2, %v1797_v32  ;;  %p1651_p1 = por %p1650_p0, %p1649_p13 }
  0x61   :  { %v275_v24 = vld [vmem:[#allocation7 + $0x98] sm:$0xff]  ;;  %v1273_v26 = vpack.c.bf16 %v270_v22, %v268_v21  ;;  %v272_v28 = vld [vmem:[#allocation7 + $0x80] sm:$0xff]  ;;  %v274_v29 = vld [vmem:[#allocation7 + $0x90] sm:$0xff] }
  0x62   :  { %v1275_v27 = vpack.c.bf16 %v275_v24, %v273_v23  ;;  %v277_v30 = vld [vmem:[#allocation7 + $0xa8] sm:$0xff]  ;;  %v279_v31 = vld [vmem:[#allocation7 + $0xb8] sm:$0xff]  ;;  %v1277_v33 = vpack.c.bf16 %v274_v29, %v272_v28  ;;  %v276_v35 = vld [vmem:[#allocation7 + $0xa0] sm:$0xff]  ;;  %p1652_p2 = pnand %p1651_p1, %p1645_p12 }
  0x63   :  { %1266 = vmatpush1.bf16.msra.mxu0 %v1265_v13  ;;  %v1279_v34 = vpack.c.bf16 %v279_v31, %v277_v30  ;;  %v278_v36 = vld [vmem:[#allocation7 + $0xb0] sm:$0xff]  ;;  %v281_v37 = vld [vmem:[#allocation7 + $0xc8] sm:$0xff]  ;;  %v283_v38 = vld [vmem:[#allocation7 + $0xd8] sm:$0xff] }
  0x64   :  { %1268 = vmatprep.subr.bf16.mxu0 %v1267_v14  ;;  %v1281_v40 = vpack.c.bf16 %v278_v36, %v276_v35  ;;  %v280_v41 = vld [vmem:[#allocation7 + $0xc0] sm:$0xff]  ;;  %v282_v42 = vld [vmem:[#allocation7 + $0xd0] sm:$0xff]  ;;  %v285_v43 = vld [vmem:[#allocation7 + $0xe8] sm:$0xff]  ;;  %v1283_v44 = vpack.c.bf16 %v283_v38, %v281_v37 }
  0x65   :  { %v287_v45 = vld [vmem:[#allocation7 + $0xf8] sm:$0xff]  ;;  %v1285_v55 = vpack.c.bf16 %v282_v42, %v280_v41  ;;  %v284_v61 = vld [vmem:[#allocation7 + $0xe0] sm:$0xff]  ;;  %v286_v62 = vld [vmem:[#allocation7 + $0xf0] sm:$0xff] }
  0x66   :  { %v1802_v46 = vld [vmem:[#allocation5] ss:$4 sm:$0xf]  ;;  %v1804_v48 = vld [vmem:[#allocation5 + $0x1] ss:$4 sm:$0xf]  ;;  %v1287_v56 = vpack.c.bf16 %v287_v45, %v285_v43  ;;  %v1289_v8 = vpack.c.bf16 %v286_v62, %v284_v61 }
  0x67   :  { %1270 = vmatpush1.bf16.msra.mxu0 %v1269_v19  ;;  %v98_v47 = vld [vmem:[#allocation2 + $0x8] sm:$0xff]  ;;  %v124_v50 = vrot.slane %v1802_v46, %v1800_v39  ;;  %v149_v53 = vrot.slane %v1804_v48, %v1800_v39  ;;  %v289_v3 = vld [vmem:[#allocation7 + $0x108] sm:$0xff]  ;;  %v288_v10 = vld [vmem:[#allocation7 + $0x100] sm:$0xff]  ;;  %v1820_v19 = vsub.s32 0, %v1797_v32  ;;  %v1826_v28 = vrot.slane %v1804_v48, %v127_v16 }
  0x68   :  { %1272 = vmatprep.subr.bf16.mxu0 %v1271_v20  ;;  %v1806_v49 = vld [vmem:[#allocation5 + $0x2] ss:$4 sm:$0xf]  ;;  %v1814_v57 = vld [vmem:[#allocation5 + $0x3] ss:$4 sm:$0xf] }
  0x69   :  { %v103_v51 = vld [vmem:[#allocation2 + $0x28] sm:$0xff]  ;;  %v178_v54 = vrot.slane %v1806_v49, %v1800_v39  ;;  %v138_v59 = vmul.f32 %v124_v50, %v98_v47  ;;  %v207_v6 = vrot.slane %v1814_v57, %v1800_v39  ;;  %v290_v11 = vld [vmem:[#allocation7 + $0x110] sm:$0xff]  ;;  %v293_v14 = vld [vmem:[#allocation7 + $0x128] sm:$0xff]  ;;  %v120_v30 = vrot.slane %v1802_v46, %v1820_v19 }
  0x6a   :  { %v108_v52 = vld [vmem:[#allocation2 + $0x48] sm:$0xff]  ;;  %v225_v60 = vmul.f32 %v124_v50, %v103_v51  ;;  %v163_v63 = vmul.f32 %v149_v53, %v103_v51  ;;  %v1293_v20 = vpack.c.bf16 %v290_v11, %v288_v10  ;;  %v292_v22 = vld [vmem:[#allocation7 + $0x120] sm:$0xff]  ;;  %v294_v23 = vld [vmem:[#allocation7 + $0x130] sm:$0xff]  ;;  %v145_v31 = vrot.slane %v1804_v48, %v1820_v19 }
  0x6b   :  { %1274 = vmatpush1.bf16.msra.mxu0 %v1273_v26  ;;  %v113_v58 = vld [vmem:[#allocation2 + $0x68] sm:$0xff]  ;;  %v192_v0 = vmul.f32 %v178_v54, %v108_v52  ;;  %v229_v1 = vmul.f32 %v149_v53, %v108_v52  ;;  %v297_v25 = vld [vmem:[#allocation7 + $0x148] sm:$0xff]  ;;  %v102_v35 = vld [vmem:[#allocation2 + $0x20] sm:$0xff]  ;;  %v1833_v37 = vrot.slane %v1806_v49, %v127_v16  ;;  %v1836_v38 = vrot.slane %v1814_v57, %v127_v16 }
  0x6c   :  { %1276 = vmatprep.subr.bf16.mxu0 %v1275_v27  ;;  %v237_v2 = vmul.f32 %v178_v54, %v113_v58  ;;  %v291_v4 = vld [vmem:[#allocation7 + $0x118] sm:$0xff]  ;;  %v167_v5 = vadd.f32 %v163_v63, %v138_v59  ;;  %v1823_v27 = vrot.slane %v1802_v46, %v127_v16  ;;  %v107_v36 = vld [vmem:[#allocation2 + $0x40] sm:$0xff]  ;;  %v296_v41 = vld [vmem:[#allocation7 + $0x140] sm:$0xff]  ;;  %v174_v45 = vrot.slane %v1806_v49, %v1820_v19 }
  0x6d   :  { %v233_v7 = vadd.f32 %v229_v1, %v225_v60  ;;  %v1291_v9 = vpack.c.bf16 %v291_v4, %v289_v3  ;;  %v295_v15 = vld [vmem:[#allocation7 + $0x138] sm:$0xff]  ;;  %v298_v42 = vld [vmem:[#allocation7 + $0x150] sm:$0xff]  ;;  %v301_v43 = vld [vmem:[#allocation7 + $0x168] sm:$0xff]  ;;  %v162_v50 = vmul.f32 %v145_v31, %v102_v35  ;;  %v224_v51 = vmul.f32 %v120_v30, %v102_v35 }
  0x6e   :  { %v196_v12 = vadd.f32 %v192_v0, %v167_v5  ;;  %v1295_v21 = vpack.c.bf16 %v295_v15, %v293_v14  ;;  %v299_v26 = vld [vmem:[#allocation7 + $0x158] sm:$0xff]  ;;  %v228_v52 = vmul.f32 %v145_v31, %v107_v36  ;;  %v1301_v53 = vpack.c.bf16 %v298_v42, %v296_v41  ;;  %v300_v54 = vld [vmem:[#allocation7 + $0x160] sm:$0xff]  ;;  %v302_v59 = vld [vmem:[#allocation7 + $0x170] sm:$0xff] }
  0x6f   :  { %1278 = vmatpush1.bf16.msra.mxu0 %v1277_v33  ;;  %v241_v13 = vadd.f32 %v237_v2, %v233_v7  ;;  %v1297_v33 = vpack.c.bf16 %v294_v23, %v292_v22  ;;  %v305_v60 = vld [vmem:[#allocation7 + $0x188] sm:$0xff]  ;;  %v307_v61 = vld [vmem:[#allocation7 + $0x198] sm:$0xff]  ;;  %v304_v62 = vld [vmem:[#allocation7 + $0x180] sm:$0xff]  ;;  %v191_v5 = vmul.f32 %v174_v45, %v107_v36  ;;  %v203_v16 = vrot.slane %v1814_v57, %v1820_v19 }
  0x70   :  { %1280 = vmatprep.subr.bf16.mxu0 %v1279_v34  ;;  %v221_v17 = vadd.f32 %v207_v6, %v196_v12  ;;  %v97_v34 = vld [vmem:[#allocation2] sm:$0xff]  ;;  %v1841_v0 = vld [vmem:[#allocation7 + $0x1a8] sm:$0xff]  ;;  %v1843_v1 = vld [vmem:[#allocation7 + $0x1b8] sm:$0xff]  ;;  %v1307_v11 = vpack.c.bf16 %v307_v61, %v305_v60 }
  0x71   :  { %v245_v18 = vadd.f32 %v241_v13, %v207_v6  ;;  %v137_v47 = vmul.f32 %v120_v30, %v97_v34  ;;  %v306_v63 = vld [vmem:[#allocation7 + $0x190] sm:$0xff]  ;;  %v1845_v2 = vld [vmem:[#allocation7 + $0x1a0] sm:$0xff]  ;;  %v232_v6 = vadd.f32 %v228_v52, %v224_v51  ;;  %v1311_v13 = vpack.c.bf16 %v1843_v1, %v1841_v0  ;;  %v115_v22 = vld [vmem:[#allocation2 + $0x78] sm:$0xff] }
  0x72   :  { %v1847_v3 = vld [vmem:[#allocation7 + $0x1b0] sm:$0xff]  ;;  %v1309_v12 = vpack.c.bf16 %v306_v63, %v304_v62  ;;  %v104_v30 = vld [vmem:[#allocation2 + $0x30] sm:$0xff]  ;;  %v543_v63 = vld [vmem:[#allocation8 + $0x18] sm:$0xff] }
  0x73   :  { %1282 = vmatpush1.bf16.msra.mxu0 %v1281_v40  ;;  %v249_v24 = vmax.f32 %v221_v17, %v245_v18  ;;  %v1299_v40 = vpack.c.bf16 %v299_v26, %v297_v25  ;;  %v166_v4 = vadd.f32 %v162_v50, %v137_v47  ;;  %v1313_v14 = vpack.c.bf16 %v1847_v3, %v1845_v2  ;;  %v100_v18 = vld [vmem:[#allocation2 + $0x18] sm:$0xff]  ;;  %v109_v34 = vld [vmem:[#allocation2 + $0x50] sm:$0xff] }
  0x74   :  { %1284 = vmatprep.subr.bf16.mxu0 %v1283_v44  ;;  %v303_v44 = vld [vmem:[#allocation7 + $0x178] sm:$0xff]  ;;  %v114_v35 = vld [vmem:[#allocation2 + $0x70] sm:$0xff]  ;;  %v164_v36 = vmul.f32 %v1826_v28, %v104_v30  ;;  %v193_v42 = vmul.f32 %v1833_v37, %v109_v34  ;;  %v541_v50 = vld [vmem:[#allocation8 + $0x8] sm:$0xff] }
  0x75   :  { %v253_v29 = vmax.f32 %v249_v24, 0.0  ;;  %v1303_v58 = vpack.c.bf16 %v303_v44, %v301_v43  ;;  %v195_v15 = vadd.f32 %v191_v5, %v166_v4  ;;  %v226_v43 = vmul.f32 %v1823_v27, %v104_v30  ;;  %v540_v47 = vld [vmem:[#allocation8] sm:$0xff]  ;;  %v561_v0 = vld [vmem:[#allocation8 + $0xa8] sm:$0xff]  ;;  %v314_v4 = vld [vmem:[#allocation7 + $0x1d0] sm:$0xff] }
  0x76   :  { %v230_v44 = vmul.f32 %v1826_v28, %v109_v34  ;;  %v1389_v61 = vpack.c.bf16 %v541_v50, %v540_v47  ;;  %v312_v1 = vld [vmem:[#allocation7 + $0x1c0] sm:$0xff] }
  0x77   :  { %1286 = vmatpush1.bf16.msra.mxu0 %v1285_v55  ;;  %460 = vmatprep.mubr.f32.mxu0 %v253_v29  ;;  %v112_v55 = vld [vmem:[#allocation2 + $0x60] sm:$0xff]  ;;  %v99_v29 = vld [vmem:[#allocation2 + $0x10] sm:$0xff] }
  0x78   :  { %1288 = vmatprep.subr.bf16.mxu0 %v1287_v56  ;;  %v131_v56 = vsub.s32 3, %v1797_v32  ;;  %v236_v7 = vmul.f32 %v174_v45, %v112_v55  ;;  %v1305_v32 = vpack.c.bf16 %v302_v59, %v300_v54  ;;  %v557_v45 = vld [vmem:[#allocation8 + $0x88] sm:$0xff]  ;;  %v558_v55 = vld [vmem:[#allocation8 + $0x90] sm:$0xff]  ;;  %v234_v60 = vadd.f32 %v230_v44, %v226_v43  ;;  %v548_v44 = vld [vmem:[#allocation8 + $0x40] sm:$0xff] }
  0x7a   :  { %v186_v10 = vrot.slane %v1806_v49, %v131_v56  ;;  %v240_v17 = vadd.f32 %v236_v7, %v232_v6  ;;  %v1861_v49 = vld [vmem:[#allocation7 + $0x1c8] sm:$0xff]  ;;  %v319_v7 = vld [vmem:[#allocation7 + $0x1f8] sm:$0xff] }
  0x7b   :  { %1290 = vmatpush1.bf16.msra.mxu0 %v1289_v8  ;;  %v132_v8 = vrot.slane %v1802_v46, %v131_v56  ;;  %v105_v46 = vld [vmem:[#allocation2 + $0x38] sm:$0xff] }
  0x7c   :  { %1292 = vmatprep.subr.bf16.mxu0 %v1291_v9  ;;  %v157_v9 = vrot.slane %v1804_v48, %v131_v56  ;;  %v1859_v48 = vrot.slane %v1814_v57, %v131_v56  ;;  %v139_v57 = vmul.f32 %v1823_v27, %v99_v29  ;;  %v559_v56 = vld [vmem:[#allocation8 + $0x98] sm:$0xff]  ;;  %v560_v27 = vld [vmem:[#allocation8 + $0xa0] sm:$0xff]  ;;  %v317_v6 = vld [vmem:[#allocation7 + $0x1e8] sm:$0xff] }
  0x7d   :  { %v140_v23 = vmul.f32 %v132_v8, %v100_v18  ;;  %v227_v26 = vmul.f32 %v132_v8, %v105_v46  ;;  %v1391_v62 = vpack.c.bf16 %v559_v56, %v558_v55  ;;  %v545_v18 = vld [vmem:[#allocation8 + $0x28] sm:$0xff]  ;;  %v547_v29 = vld [vmem:[#allocation8 + $0x38] sm:$0xff]  ;;  %v326_v55 = vld [vmem:[#allocation7 + $0x230] sm:$0xff] }
  0x7e   :  { %v165_v24 = vmul.f32 %v157_v9, %v105_v46  ;;  %v168_v52 = vadd.f32 %v164_v36, %v139_v57  ;;  %v1317_v46 = vpack.c.bf16 %v314_v4, %v312_v1  ;;  %v322_v57 = vld [vmem:[#allocation7 + $0x210] sm:$0xff]  ;;  %v325_v36 = vld [vmem:[#allocation7 + $0x228] sm:$0xff]  ;;  %v328_v1 = vld [vmem:[#allocation7 + $0x240] sm:$0xff] }
  0x7f   :  { %1294 = vmatpush1.bf16.msra.mxu0 %v1293_v20  ;;  %v110_v20 = vld [vmem:[#allocation2 + $0x58] sm:$0xff]  ;;  %v330_v4 = vld [vmem:[#allocation7 + $0x250] sm:$0xff] }
  0x80   :  { %1296 = vmatprep.subr.bf16.mxu0 %v1295_v21  ;;  %v1863_v21 = vld [vmem:[#allocation7 + $0x1d8] sm:$0xff]  ;;  %v194_v25 = vmul.f32 %v186_v10, %v110_v20  ;;  %v231_v31 = vmul.f32 %v157_v9, %v110_v20  ;;  %v169_v41 = vadd.f32 %v165_v24, %v140_v23  ;;  %v220_v9 = vadd.f32 %v203_v16, %v195_v15  ;;  %v562_v15 = vld [vmem:[#allocation8 + $0xb0] sm:$0xff]  ;;  %v321_v24 = vld [vmem:[#allocation7 + $0x208] sm:$0xff] }
  0x81   :  { %v1315_v28 = vpack.c.bf16 %v1863_v21, %v1861_v49  ;;  %v318_v23 = vld [vmem:[#allocation7 + $0x1f0] sm:$0xff]  ;;  %v329_v56 = vld [vmem:[#allocation7 + $0x248] sm:$0xff] }
  0x82   :  { %v235_v51 = vadd.f32 %v231_v31, %v227_v26  ;;  %v198_v59 = vadd.f32 %v194_v25, %v169_v41  ;;  %v323_v25 = vld [vmem:[#allocation7 + $0x218] sm:$0xff]  ;;  %v564_v31 = vld [vmem:[#allocation8 + $0xc0] sm:$0xff] }
  0x83   :  { %1298 = vmatpush1.bf16.msra.mxu0 %v1297_v33  ;;  %v239_v33 = vmul.f32 %v186_v10, %v115_v22  ;;  %v244_v10 = vadd.f32 %v240_v17, %v203_v16  ;;  %v563_v16 = vld [vmem:[#allocation8 + $0xb8] sm:$0xff]  ;;  %v1319_v17 = vpack.c.bf16 %v319_v7, %v317_v6  ;;  %v316_v22 = vld [vmem:[#allocation7 + $0x1e0] sm:$0xff]  ;;  %v1323_v34 = vpack.c.bf16 %v323_v25, %v321_v24  ;;  %v342_v24 = vld [vmem:[#allocation7 + $0x2b0] sm:$0xff] }
  0x84   :  { %1300 = vmatprep.subr.bf16.mxu0 %v1299_v40  ;;  %v556_v40 = vld [vmem:[#allocation8 + $0x80] sm:$0xff]  ;;  %v223_v20 = vadd.f32 %v1859_v48, %v198_v59  ;;  %v1399_v26 = vpack.c.bf16 %v563_v16, %v562_v15  ;;  %v341_v15 = vld [vmem:[#allocation7 + $0x2a8] sm:$0xff]  ;;  %v343_v16 = vld [vmem:[#allocation7 + $0x2b8] sm:$0xff] }
  0x85   :  { %v1387_v54 = vpack.c.bf16 %v557_v45, %v556_v40  ;;  %v243_v5 = vadd.f32 %v239_v33, %v235_v51  ;;  %v565_v33 = vld [vmem:[#allocation8 + $0xc8] sm:$0xff]  ;;  %v327_v40 = vld [vmem:[#allocation7 + $0x238] sm:$0xff]  ;;  %v566_v51 = vld [vmem:[#allocation8 + $0xd0] sm:$0xff] }
  0x86   :  { %v1403_v43 = vpack.c.bf16 %v565_v33, %v564_v31  ;;  %v549_v45 = vld [vmem:[#allocation8 + $0x48] sm:$0xff] }
  0x87   :  { %1302 = vmatpush1.bf16.msra.mxu0 %v1301_v53  ;;  %v238_v53 = vmul.f32 %v1833_v37, %v114_v35  ;;  %v197_v37 = vadd.f32 %v193_v42, %v168_v52  ;;  %1388 = vmatprep.subr.bf16.mxu1 %v1387_v54  ;;  %v247_v49 = vadd.f32 %v243_v5, %v1859_v48  ;;  %v546_v48 = vld [vmem:[#allocation8 + $0x30] sm:$0xff]  ;;  %v320_v35 = vld [vmem:[#allocation7 + $0x200] sm:$0xff]  ;;  %v567_v52 = vld [vmem:[#allocation8 + $0xd8] sm:$0xff] }
  0x88   :  { %1304 = vmatprep.subr.bf16.mxu0 %v1303_v58  ;;  %v542_v58 = vld [vmem:[#allocation8 + $0x10] sm:$0xff]  ;;  %1390 = vmatpush3.bf16.msra.mxu1 %v1389_v61  ;;  %v1401_v41 = vpack.c.bf16 %v547_v29, %v546_v48  ;;  %v1325_v47 = vpack.c.bf16 %v322_v57, %v320_v35  ;;  %v324_v54 = vld [vmem:[#allocation7 + $0x220] sm:$0xff]  ;;  %v1405_v59 = vpack.c.bf16 %v549_v45, %v548_v44  ;;  %v333_v5 = vld [vmem:[#allocation7 + $0x268] sm:$0xff] }
  0x89   :  { %v1393_v8 = vpack.c.bf16 %v543_v63, %v542_v58  ;;  %1392 = vmatprep.subr.bf16.mxu1 %v1391_v62  ;;  %v251_v30 = vmax.f32 %v223_v20, %v247_v49  ;;  %v331_v58 = vld [vmem:[#allocation7 + $0x258] sm:$0xff]  ;;  %v550_v61 = vld [vmem:[#allocation8 + $0x50] sm:$0xff]  ;;  %v1329_v63 = vpack.c.bf16 %v326_v55, %v324_v54  ;;  %v336_v20 = vld [vmem:[#allocation7 + $0x280] sm:$0xff] }
  0x8a   :  { %v551_v62 = vld [vmem:[#allocation8 + $0x58] sm:$0xff]  ;;  %v338_v49 = vld [vmem:[#allocation7 + $0x290] sm:$0xff]  ;;  %v345_v25 = vld [vmem:[#allocation7 + $0x2c8] sm:$0xff] }
  0x8b   :  { %1306 = vmatpush1.bf16.msra.mxu0 %v1305_v32  ;;  %v242_v32 = vadd.f32 %v238_v53, %v234_v60  ;;  %v255_v50 = vmax.f32 %v251_v30, 0.0  ;;  %v1327_v53 = vpack.c.bf16 %v327_v40, %v325_v36  ;;  %v1407_v60 = vpack.c.bf16 %v567_v52, %v566_v51  ;;  %v344_v48 = vld [vmem:[#allocation7 + $0x2c0] sm:$0xff]  ;;  %v346_v29 = vld [vmem:[#allocation7 + $0x2d0] sm:$0xff]  ;;  %v351_v30 = vld [vmem:[#allocation7 + $0x2f8] sm:$0xff] }
  0x8c   :  { %1308 = vmatprep.subr.bf16.mxu0 %v1307_v11  ;;  %v1874_v11 = vadd.f32 %v1836_v38, %v197_v37  ;;  %1394 = vmatpush3.bf16.msra.mxu1 %v1393_v8  ;;  %v335_v37 = vld [vmem:[#allocation7 + $0x278] sm:$0xff]  ;;  %v1409_v6 = vpack.c.bf16 %v551_v62, %v550_v61  ;;  %v1349_v31 = vpack.c.bf16 %v346_v29, %v344_v48  ;;  %v350_v35 = vld [vmem:[#allocation7 + $0x2f0] sm:$0xff]  ;;  %v353_v57 = vld [vmem:[#allocation7 + $0x308] sm:$0xff] }
  0x8d   :  { %v1882_v21 = vadd.f32 %v242_v32, %v1836_v38  ;;  %v1321_v38 = vpack.c.bf16 %v318_v23, %v316_v22  ;;  %v1333_v32 = vpack.c.bf16 %v330_v4, %v328_v1  ;;  %v1335_v8 = vpack.c.bf16 %v335_v37, %v333_v5  ;;  %v340_v23 = vld [vmem:[#allocation7 + $0x2a0] sm:$0xff]  ;;  %v355_v36 = vld [vmem:[#allocation7 + $0x318] sm:$0xff]  ;;  %v357_v44 = vld [vmem:[#allocation7 + $0x328] sm:$0xff] }
  0x8e   :  { %v1343_v22 = vpack.c.bf16 %v343_v16, %v341_v15  ;;  %v359_v45 = vld [vmem:[#allocation7 + $0x338] sm:$0xff]  ;;  %v356_v51 = vld [vmem:[#allocation7 + $0x320] sm:$0xff]  ;;  %v358_v52 = vld [vmem:[#allocation7 + $0x330] sm:$0xff] }
  0x8f   :  { %1310 = vmatpush1.bf16.msra.mxu0 %v1309_v12  ;;  %v1395_v12 = vpack.c.bf16 %v561_v0, %v560_v27  ;;  %v250_v2 = vmax.f32 %v1874_v11, %v1882_v21  ;;  %v568_v27 = vld [vmem:[#allocation8 + $0xe0] sm:$0xff]  ;;  %v569_v0 = vld [vmem:[#allocation8 + $0xe8] sm:$0xff]  ;;  %v363_v54 = vld [vmem:[#allocation7 + $0x358] sm:$0xff]  ;;  %v1361_v55 = vpack.c.bf16 %v358_v52, %v356_v51 }
  0x90   :  { %1312 = vmatprep.subr.bf16.mxu0 %v1311_v13  ;;  %v544_v13 = vld [vmem:[#allocation8 + $0x20] sm:$0xff]  ;;  %v1411_v7 = vpack.c.bf16 %v569_v0, %v568_v27  ;;  %v367_v61 = vld [vmem:[#allocation7 + $0x378] sm:$0xff]  ;;  %v366_v0 = vld [vmem:[#allocation7 + $0x370] sm:$0xff] }
  0x91   :  { %v1397_v3 = vpack.c.bf16 %v545_v18, %v544_v13  ;;  %1396 = vmatprep.subr.bf16.mxu1 %v1395_v12  ;;  %v337_v12 = vld [vmem:[#allocation7 + $0x288] sm:$0xff]  ;;  %v339_v13 = vld [vmem:[#allocation7 + $0x298] sm:$0xff]  ;;  %v364_v27 = vld [vmem:[#allocation7 + $0x360] sm:$0xff] }
  0x92   :  { %v371_v1 = vld [vmem:[#allocation7 + $0x398] sm:$0xff]  ;;  %v1369_v4 = vpack.c.bf16 %v366_v0, %v364_v27  ;;  %v368_v37 = vld [vmem:[#allocation7 + $0x380] sm:$0xff]  ;;  %v378_v15 = vld [vmem:[#allocation7 + $0x3d0] sm:$0xff] }
  0x93   :  { %1314 = vmatpush1.bf16.msra.mxu0 %v1313_v14  ;;  %v248_v14 = vmax.f32 %v220_v9, %v244_v10  ;;  %1398 = vmatpush3.bf16.msra.mxu1 %v1397_v3  ;;  %v332_v9 = vld [vmem:[#allocation7 + $0x260] sm:$0xff]  ;;  %v334_v10 = vld [vmem:[#allocation7 + $0x270] sm:$0xff]  ;;  %v347_v3 = vld [vmem:[#allocation7 + $0x2d8] sm:$0xff] }
  0x94   :  { %1316 = vmatprep.subr.bf16.mxu0 %v1315_v28  ;;  %1400 = vmatprep.subr.bf16.mxu1 %v1399_v26  ;;  %v1331_v28 = vpack.c.bf16 %v331_v58, %v329_v56  ;;  %v1337_v18 = vpack.c.bf16 %v334_v10, %v332_v9  ;;  %v1347_v26 = vpack.c.bf16 %v347_v3, %v345_v25  ;;  %v360_v58 = vld [vmem:[#allocation7 + $0x340] sm:$0xff]  ;;  %v381_v16 = vld [vmem:[#allocation7 + $0x3e8] sm:$0xff]  ;;  %v382_v25 = vld [vmem:[#allocation7 + $0x3f0] sm:$0xff] }
  0x95   :  { %v252_v42 = vmax.f32 %v248_v14, 0.0  ;;  %v1345_v14 = vpack.c.bf16 %v342_v24, %v340_v23  ;;  %v372_v10 = vld [vmem:[#allocation7 + $0x3a0] sm:$0xff]  ;;  %v553_v48 = vld [vmem:[#allocation8 + $0x68] sm:$0xff]  ;;  %v384_v11 = vld [vmem:[%s1966_s5] ss:$8 sm:$0x3] }
  0x96   :  { %v380_v24 = vld [vmem:[#allocation7 + $0x3e0] sm:$0xff]  ;;  %v389_v21 = vrot.slane %v384_v11, %v1820_v19  ;;  %v646_v51 = vld [vmem:[#allocation10 + $0x10] sm:$0xff]  ;;  %v647_v52 = vld [vmem:[#allocation10 + $0x18] sm:$0xff] }
  0x97   :  { %1318 = vmatpush1.bf16.msra.mxu0 %v1317_v46  ;;  %1402 = vmatpush3.bf16.msra.mxu1 %v1401_v41  ;;  %v1339_v46 = vpack.c.bf16 %v339_v13, %v337_v12  ;;  %v1355_v41 = vpack.c.bf16 %v355_v36, %v353_v57  ;;  %v374_v12 = vld [vmem:[#allocation7 + $0x3b0] sm:$0xff]  ;;  %v377_v13 = vld [vmem:[#allocation7 + $0x3c8] sm:$0xff]  ;;  %v1385_v3 = vpack.c.bf16 %v382_v25, %v380_v24  ;;  %v1685_v57 = vmov 0.0|0.0   ;;  %v648_v19 = vld [vmem:[#allocation10 + $0x20] sm:$0xff] }
  0x98   :  { %1320 = vmatprep.subr.bf16.mxu0 %v1319_v17  ;;  %1404 = vmatprep.subr.bf16.mxu1 %v1403_v43  ;;  %v1341_v17 = vpack.c.bf16 %v338_v49, %v336_v20  ;;  %v354_v43 = vld [vmem:[#allocation7 + $0x310] sm:$0xff]  ;;  %v376_v49 = vld [vmem:[#allocation7 + $0x3c0] sm:$0xff]  ;;  %v740_v24 = vld [vmem:[#allocation10 + $0xb8] sm:$0xff] }
  0x99   :  { %v656_v0 = vld [vmem:[#allocation10 + $0x60] sm:$0xff] }
  0x9b   :  { %1322 = vmatpush1.bf16.msra.mxu0 %v1321_v38  ;;  %1406 = vmatpush3.bf16.msra.mxu1 %v1405_v59  ;;  %v349_v38 = vld [vmem:[#allocation7 + $0x2e8] sm:$0xff]  ;;  %v362_v59 = vld [vmem:[#allocation7 + $0x350] sm:$0xff] }
  0x9c   :  { %1324 = vmatprep.subr.bf16.mxu0 %v1323_v34  ;;  %1408 = vmatprep.subr.bf16.mxu1 %v1407_v60  ;;  %v1351_v33 = vpack.c.bf16 %v351_v30, %v349_v38  ;;  %v348_v34 = vld [vmem:[#allocation7 + $0x2e0] sm:$0xff]  ;;  %v365_v60 = vld [vmem:[#allocation7 + $0x368] sm:$0xff]  ;;  %v1365_v62 = vpack.c.bf16 %v362_v59, %v360_v58  ;;  %v570_v38 = vld [vmem:[#allocation8 + $0xf0] sm:$0xff] }
  0x9d   :  { %v1353_v40 = vpack.c.bf16 %v350_v35, %v348_v34  ;;  %v571_v30 = vld [vmem:[#allocation8 + $0xf8] sm:$0xff]  ;;  %v652_v59 = vld [vmem:[#allocation10 + $0x40] sm:$0xff] }
  0x9e   :  { %461 = vmatmul.mubr.f32.vlgmr.msra.gmra.mrb[0].mxu0 %v252_v42  ;;  %v352_v42 = vld [vmem:[#allocation7 + $0x300] sm:$0xff]  ;;  %v555_v34 = vld [vmem:[#allocation8 + $0x78] sm:$0xff] }
  0x9f   :  { %1326 = vmatpush1.bf16.msra.mxu0 %v1325_v47  ;;  %531 = vmatprep.mubr.f32.mxu0 %v255_v50  ;;  %v1357_v47 = vpack.c.bf16 %v354_v43, %v352_v42  ;;  %v1359_v50 = vpack.c.bf16 %v359_v45, %v357_v44  ;;  %v644_v42 = vld [vmem:[#allocation10] sm:$0xff]  ;;  %v645_v43 = vld [vmem:[#allocation10 + $0x8] sm:$0xff] }
  0xa0   :  { %1328 = vmatprep.subr.bf16.mxu0 %v1327_v53  ;;  %1410 = vmatpush3.bf16.msra.mxu1 %v1409_v6  ;;  %v361_v53 = vld [vmem:[#allocation7 + $0x348] sm:$0xff]  ;;  %v370_v6 = vld [vmem:[#allocation7 + $0x390] sm:$0xff] }
  0xa1   :  { %1412 = vmatprep.subr.bf16.mxu1 %v1411_v7  ;;  %v1363_v56 = vpack.c.bf16 %v363_v54, %v361_v53  ;;  %v373_v7 = vld [vmem:[#allocation7 + $0x3a8] sm:$0xff]  ;;  %v1423_v53 = vpack.c.bf16 %v647_v52, %v646_v51  ;;  %v826_v51 = vld [vmem:[#allocation10 + $0x120] sm:$0xff] }
  0xa2   :  { %v649_v54 = vld [vmem:[#allocation10 + $0x28] sm:$0xff] }
  0xa3   :  { %1330 = vmatpush1.bf16.msra.mxu0 %v1329_v63  ;;  %v1367_v63 = vpack.c.bf16 %v367_v61, %v365_v60  ;;  %v653_v60 = vld [vmem:[#allocation10 + $0x48] sm:$0xff] }
  0xa4   :  { %1332 = vmatprep.subr.bf16.mxu0 %v1331_v28  ;;  %v369_v28 = vld [vmem:[#allocation7 + $0x388] sm:$0xff]  ;;  %v1432_v61 = vpack.c.bf16 %v653_v60, %v652_v59  ;;  %v832_v59 = vld [vmem:[#allocation10 + $0x150] sm:$0xff]  ;;  %v833_v60 = vld [vmem:[#allocation10 + $0x158] sm:$0xff] }
  0xa5   :  { %v1371_v5 = vpack.c.bf16 %v371_v1, %v369_v28  ;;  %v657_v28 = vld [vmem:[#allocation10 + $0x68] sm:$0xff] }
  0xa6   :  { %v1438_v1 = vpack.c.bf16 %v657_v28, %v656_v0  ;;  %v827_v52 = vld [vmem:[#allocation10 + $0x128] sm:$0xff]  ;;  %v836_v0 = vld [vmem:[#allocation10 + $0x170] sm:$0xff]  ;;  %v837_v28 = vld [vmem:[#allocation10 + $0x178] sm:$0xff] }
  0xa7   :  { %1334 = vmatpush1.bf16.msra.mxu0 %v1333_v32  ;;  %v375_v32 = vld [vmem:[#allocation7 + $0x3b8] sm:$0xff] }
  0xa8   :  { %1336 = vmatprep.subr.bf16.mxu0 %v1335_v8  ;;  %v1373_v8 = vpack.c.bf16 %v370_v6, %v368_v37  ;;  %v1375_v9 = vpack.c.bf16 %v375_v32, %v373_v7  ;;  %v1687_v6 = vmov 0.0   ;;  %v572_v32 = vld [vmem:[%s1966_s5 + $0x1] ss:$0 sm:$0xff] }
  0xab   :  { %1338 = vmatpush1.bf16.msra.mxu0 %v1337_v18  ;;  %v379_v18 = vld [vmem:[#allocation7 + $0x3d8] sm:$0xff] }
  0xac   :  { %1340 = vmatprep.subr.bf16.mxu0 %v1339_v46  ;;  %v1377_v46 = vpack.c.bf16 %v374_v12, %v372_v10  ;;  %v1379_v20 = vpack.c.bf16 %v379_v18, %v377_v13  ;;  %v733_v10 = vld [vmem:[#allocation10 + $0x80] sm:$0xff]  ;;  %v734_v12 = vld [vmem:[#allocation10 + $0x88] sm:$0xff] }
  0xad   :  { %v1444_v18 = vpack.c.bf16 %v734_v12, %v733_v10  ;;  %v917_v12 = vld [vmem:[#allocation10 + $0x1b0] sm:$0xff] }
  0xaf   :  { %1342 = vmatpush1.bf16.msra.mxu0 %v1341_v17  ;;  %v383_v17 = vld [vmem:[#allocation7 + $0x3f8] sm:$0xff] }
  0xb0   :  { %1344 = vmatprep.subr.bf16.mxu0 %v1343_v22  ;;  %v1381_v22 = vpack.c.bf16 %v378_v15, %v376_v49  ;;  %v1383_v23 = vpack.c.bf16 %v383_v17, %v381_v16  ;;  %v736_v49 = vld [vmem:[#allocation10 + $0x98] sm:$0xff]  ;;  %v737_v16 = vld [vmem:[#allocation10 + $0xa0] sm:$0xff]  ;;  %v738_v17 = vld [vmem:[#allocation10 + $0xa8] sm:$0xff] }
  0xb3   :  { %1346 = vmatpush1.bf16.msra.mxu0 %v1345_v14  ;;  %v254_v14 = vmax.f32 %v250_v2, 0.0  ;;  %v393_v2 = vrot.slane %v384_v11, %v1800_v39  ;;  %v1426_v39 = vpack.c.bf16 %v649_v54, %v648_v19  ;;  %v828_v19 = vld [vmem:[#allocation10 + $0x130] sm:$0xff]  ;;  %v829_v54 = vld [vmem:[#allocation10 + $0x138] sm:$0xff] }
  0xb4   :  { %1348 = vmatprep.subr.bf16.mxu0 %v1347_v26  ;;  %v552_v26 = vld [vmem:[#allocation8 + $0x60] sm:$0xff] }
  0xb5   :  { %v1413_v29 = vpack.c.bf16 %v553_v48, %v552_v26  ;;  %v743_v48 = vld [vmem:[#allocation10 + $0xd0] sm:$0xff] }
  0xb7   :  { %1350 = vmatpush1.bf16.msra.mxu0 %v1349_v31  ;;  %1414 = vmatpush3.bf16.msra.mxu1 %v1413_v29  ;;  %v1415_v31 = vpack.c.bf16 %v571_v30, %v570_v38  ;;  %v744_v29 = vld [vmem:[#allocation10 + $0xd8] sm:$0xff]  ;;  %v745_v30 = vld [vmem:[#allocation10 + $0xe0] sm:$0xff] }
  0xb8   :  { %1352 = vmatprep.subr.bf16.mxu0 %v1351_v33  ;;  %v554_v33 = vld [vmem:[#allocation8 + $0x70] sm:$0xff]  ;;  %v1459_v38 = vpack.c.bf16 %v744_v29, %v743_v48 }
  0xb9   :  { %v1417_v35 = vpack.c.bf16 %v555_v34, %v554_v33  ;;  %1416 = vmatprep.subr.bf16.mxu1 %v1415_v31  ;;  %v746_v31 = vld [vmem:[#allocation10 + $0xe8] sm:$0xff]  ;;  %v747_v34 = vld [vmem:[#allocation10 + $0xf0] sm:$0xff] }
  0xba   :  { %v1462_v33 = vpack.c.bf16 %v746_v31, %v745_v30  ;;  %v925_v29 = vld [vmem:[#allocation10 + $0x1f0] sm:$0xff] }
  0xbb   :  { %1354 = vmatpush1.bf16.msra.mxu0 %v1353_v40  ;;  %1418 = vmatpush3.bf16.msra.mxu1 %v1417_v35  ;;  %v748_v35 = vld [vmem:[#allocation10 + $0xf8] sm:$0xff]  ;;  %v838_v31 = vld [vmem:[%s1966_s5 + $0x4] ss:$0 sm:$0xff] }
  0xbc   :  { %1356 = vmatprep.subr.bf16.mxu0 %v1355_v41  ;;  %1419 = vmatprep.subr.bf16.mxu1 %v1685_v57  ;;  %v1465_v11 = vpack.c.bf16 %v748_v35, %v747_v34 }
  0xbf   :  { %1358 = vmatpush1.bf16.msra.mxu0 %v1357_v47  ;;  %v1420_v47 = vpack.c.bf16 %v645_v43, %v644_v42 }
  0xc0   :  { %1360 = vmatprep.subr.bf16.mxu0 %v1359_v50 }
  0xc3   :  { %1362 = vmatpush1.bf16.msra.mxu0 %v1361_v55  ;;  %v650_v55 = vld [vmem:[#allocation10 + $0x30] sm:$0xff] }
  0xc4   :  { %1364 = vmatprep.subr.bf16.mxu0 %v1363_v56  ;;  %v651_v56 = vld [vmem:[#allocation10 + $0x38] sm:$0xff] }
  0xc5   :  { %v1429_v58 = vpack.c.bf16 %v651_v56, %v650_v55  ;;  %v830_v55 = vld [vmem:[#allocation10 + $0x140] sm:$0xff]  ;;  %v831_v56 = vld [vmem:[#allocation10 + $0x148] sm:$0xff] }
  0xc7   :  { %1366 = vmatpush1.bf16.msra.mxu0 %v1365_v62  ;;  %v654_v62 = vld [vmem:[#allocation10 + $0x50] sm:$0xff] }
  0xc8   :  { %1368 = vmatprep.subr.bf16.mxu0 %v1367_v63  ;;  %v655_v63 = vld [vmem:[#allocation10 + $0x58] sm:$0xff] }
  0xc9   :  { %v1435_v27 = vpack.c.bf16 %v655_v63, %v654_v62  ;;  %v834_v62 = vld [vmem:[#allocation10 + $0x160] sm:$0xff]  ;;  %v835_v63 = vld [vmem:[#allocation10 + $0x168] sm:$0xff] }
  0xcb   :  { %1370 = vmatpush1.bf16.msra.mxu0 %v1369_v4  ;;  %v658_v4 = vld [vmem:[#allocation10 + $0x70] sm:$0xff] }
  0xcc   :  { %1372 = vmatprep.subr.bf16.mxu0 %v1371_v5  ;;  %v659_v5 = vld [vmem:[#allocation10 + $0x78] sm:$0xff] }
  0xcd   :  { %v1441_v37 = vpack.c.bf16 %v659_v5, %v658_v4  ;;  %v911_v4 = vld [vmem:[#allocation10 + $0x180] sm:$0xff]  ;;  %v912_v5 = vld [vmem:[#allocation10 + $0x188] sm:$0xff] }
  0xcf   :  { %1374 = vmatpush1.bf16.msra.mxu0 %v1373_v8 }
  0xd0   :  { %1376 = vmatprep.subr.bf16.mxu0 %v1375_v9 }
  0xd3   :  { %1378 = vmatpush1.bf16.msra.mxu0 %v1377_v46 }
  0xd4   :  { %1380 = vmatprep.subr.bf16.mxu0 %v1379_v20  ;;  %v735_v20 = vld [vmem:[#allocation10 + $0x90] sm:$0xff] }
  0xd5   :  { %v1447_v15 = vpack.c.bf16 %v736_v49, %v735_v20  ;;  %v920_v20 = vld [vmem:[#allocation10 + $0x1c8] sm:$0xff] }
  0xd7   :  { %1382 = vmatpush1.bf16.msra.mxu0 %v1381_v22  ;;  %v1450_v22 = vpack.c.bf16 %v738_v17, %v737_v16  ;;  %v922_v16 = vld [vmem:[#allocation10 + $0x1d8] sm:$0xff] }
  0xd8   :  { %1384 = vmatprep.subr.bf16.mxu0 %v1383_v23  ;;  %v739_v23 = vld [vmem:[#allocation10 + $0xb0] sm:$0xff] }
  0xd9   :  { %v1453_v25 = vpack.c.bf16 %v740_v24, %v739_v23  ;;  %v924_v23 = vld [vmem:[#allocation10 + $0x1e8] sm:$0xff] }
  0xdb   :  { %1386 = vmatpush1.bf16.msra.mxu0 %v1385_v3  ;;  %v741_v3 = vld [vmem:[#allocation10 + $0xc0] sm:$0xff] }
  0xdc   :  { %1491 = vmatprep.subr.bf16.mxu0 %v1685_v57 }
  0xde   :  { %532 = vmatmul.mubr.f32.vlgmr.msra.gmra.mrb[0].mxu0 %v254_v14  ;;  %v742_v14 = vld [vmem:[#allocation10 + $0xc8] sm:$0xff] }
  0xdf   :  { %1256 = vmatprep.mubr.msk.f32.mxu0 %vm1686_vm0, %v1687_v6  ;;  %v1456_v26 = vpack.c.bf16 %v742_v14, %v741_v3 }
 0x1b1   :  { %v533_v36 = vpop.f32.mrb[0].mxu0 }
 0x1b2   :  { %v1515_v40 = vadd.f32 %v533_v36, %v389_v21  ;;  %v535_v41 = vpop.f32.mrb[1].mxu0  ;;  %v660_v21 = vld [vmem:[%s1966_s5 + $0x2] ss:$0 sm:$0xff]  ;;  %v823_v36 = vld [vmem:[#allocation10 + $0x108] sm:$0xff] }
 0x1b3   :  { %v1516_v44 = vadd.f32 %v535_v41, %v393_v2  ;;  %v822_v2 = vld [vmem:[#allocation10 + $0x100] sm:$0xff] }
 0x1b4   :  { %v538_v50 = vmax.f32 %v1515_v40, 0.0  ;;  %v1468_v43 = vpack.c.bf16 %v823_v36, %v822_v2 }
 0x1b5   :  { %v539_v45 = vmax.f32 %v1516_v44, 0.0 }
 0x1b7   :  { %637 = vmatprep.mubr.f32.mxu1 %v539_v45  ;;  %v824_v45 = vld [vmem:[#allocation10 + $0x110] sm:$0xff] }
 0x1b8   :  { %638 = vmatmul.mubr.f32.vlgmr.msra.gmra.mrb[0].mxu1 %v538_v50 }
 0x1b9   :  { %1421 = vmatpush3.bf16.msra.mxu1 %v1420_v47  ;;  %1151 = vmatprep.mubr.msk.f32.mxu1 %vm1686_vm0, %v1687_v6  ;;  %v825_v47 = vld [vmem:[#allocation10 + $0x118] sm:$0xff] }
 0x1ba   :  { %1422 = vmatprep.subr.bf16.mxu1 %v1685_v57  ;;  %v1471_v50 = vpack.c.bf16 %v825_v47, %v824_v45 }
 0x1bd   :  { %1424 = vmatpush3.bf16.msra.mxu1 %v1423_v53  ;;  %v1474_v53 = vpack.c.bf16 %v827_v52, %v826_v51 }
 0x1be   :  { %1425 = vmatprep.subr.bf16.mxu1 %v1685_v57 }
 0x1c1   :  { %1427 = vmatpush3.bf16.msra.mxu1 %v1426_v39  ;;  %v1477_v39 = vpack.c.bf16 %v829_v54, %v828_v19 }
 0x1c2   :  { %1428 = vmatprep.subr.bf16.mxu1 %v1685_v57 }
 0x1c5   :  { %1430 = vmatpush3.bf16.msra.mxu1 %v1429_v58  ;;  %v1480_v58 = vpack.c.bf16 %v831_v56, %v830_v55 }
 0x1c6   :  { %1431 = vmatprep.subr.bf16.mxu1 %v1685_v57 }
 0x1c9   :  { %1433 = vmatpush3.bf16.msra.mxu1 %v1432_v61  ;;  %v1483_v61 = vpack.c.bf16 %v833_v60, %v832_v59 }
 0x1ca   :  { %1434 = vmatprep.subr.bf16.mxu1 %v1685_v57 }
 0x1cd   :  { %1436 = vmatpush3.bf16.msra.mxu1 %v1435_v27  ;;  %v1486_v27 = vpack.c.bf16 %v835_v63, %v834_v62 }
 0x1ce   :  { %1437 = vmatprep.subr.bf16.mxu1 %v1685_v57 }
 0x1d1   :  { %1439 = vmatpush3.bf16.msra.mxu1 %v1438_v1  ;;  %v1489_v1 = vpack.c.bf16 %v837_v28, %v836_v0 }
 0x1d2   :  { %1440 = vmatprep.subr.bf16.mxu1 %v1685_v57 }
 0x1d5   :  { %1442 = vmatpush3.bf16.msra.mxu1 %v1441_v37  ;;  %v913_v37 = vld [vmem:[#allocation10 + $0x190] sm:$0xff] }
 0x1d6   :  { %1443 = vmatprep.subr.bf16.mxu1 %v1685_v57 }
 0x28b   :  { %v1048_v7 = vpop.f32.mrb[0].mxu1 }
 0x28c   :  { %v1049_v8 = vpop.f32.mrb[1].mxu1 }
 0x28d   :  { %v1050_v9 = vadd.f32 %v1049_v8, %v1048_v7  ;;  %v914_v7 = vld [vmem:[#allocation10 + $0x198] sm:$0xff]  ;;  %v915_v8 = vld [vmem:[#allocation10 + $0x1a0] sm:$0xff] }
 0x28f   :  { %v640_v13 = vadd.f32 %v1050_v9, %v572_v32  ;;  %v1495_v32 = vpack.c.bf16 %v914_v7, %v913_v37  ;;  %v916_v9 = vld [vmem:[#allocation10 + $0x1a8] sm:$0xff] }
 0x290   :  { %v1498_v10 = vpack.c.bf16 %v916_v9, %v915_v8 }
 0x291   :  { %v643_v46 = vmax.f32 %v640_v13, 0.0  ;;  %v918_v13 = vld [vmem:[#allocation10 + $0x1b8] sm:$0xff] }
 0x293   :  { %1152 = vmatmul.mubr.f32.vlgmr.msra.gmra.mrb[2].mxu1 %v643_v46  ;;  %v919_v46 = vld [vmem:[#allocation10 + $0x1c0] sm:$0xff] }
 0x294   :  { %1445 = vmatpush3.bf16.msra.mxu1 %v1444_v18  ;;  %1186 = vmatprep.mubr.msk.f32.mxu1 %vm1686_vm0, %v1687_v6  ;;  %v1501_v18 = vpack.c.bf16 %v918_v13, %v917_v12  ;;  %v1504_v49 = vpack.c.bf16 %v920_v20, %v919_v46 }
 0x295   :  { %1446 = vmatprep.subr.bf16.mxu1 %v1685_v57 }
 0x298   :  { %1448 = vmatpush3.bf16.msra.mxu1 %v1447_v15  ;;  %v921_v15 = vld [vmem:[#allocation10 + $0x1d0] sm:$0xff] }
 0x299   :  { %1449 = vmatprep.subr.bf16.mxu1 %v1685_v57  ;;  %v1507_v17 = vpack.c.bf16 %v922_v16, %v921_v15 }
 0x29c   :  { %1451 = vmatpush3.bf16.msra.mxu1 %v1450_v22  ;;  %v923_v22 = vld [vmem:[#allocation10 + $0x1e0] sm:$0xff] }
 0x29d   :  { %1452 = vmatprep.subr.bf16.mxu1 %v1685_v57  ;;  %v1510_v24 = vpack.c.bf16 %v924_v23, %v923_v22 }
 0x2a0   :  { %1454 = vmatpush3.bf16.msra.mxu1 %v1453_v25  ;;  %v749_v25 = vld [vmem:[%s1966_s5 + $0x3] ss:$0 sm:$0xff] }
 0x2a1   :  { %1455 = vmatprep.subr.bf16.mxu1 %v1685_v57 }
 0x2a4   :  { %1457 = vmatpush3.bf16.msra.mxu1 %v1456_v26 }
 0x2a5   :  { %1458 = vmatprep.subr.bf16.mxu1 %v1685_v57 }
 0x2a8   :  { %1460 = vmatpush3.bf16.msra.mxu1 %v1459_v38  ;;  %v926_v38 = vld [vmem:[#allocation10 + $0x1f8] sm:$0xff] }
 0x2a9   :  { %1461 = vmatprep.subr.bf16.mxu1 %v1685_v57  ;;  %v1513_v30 = vpack.c.bf16 %v926_v38, %v925_v29 }
 0x2ac   :  { %1463 = vmatpush3.bf16.msra.mxu1 %v1462_v33 }
 0x2ad   :  { %1464 = vmatprep.subr.bf16.mxu1 %v1685_v57 }
 0x2b0   :  { %1466 = vmatpush3.bf16.msra.mxu1 %v1465_v11  ;;  %v927_v11 = vld [vmem:[%s1966_s5 + $0x5] ss:$0 sm:$0xff] }
 0x2b1   :  { %1467 = vmatprep.subr.bf16.mxu1 %v1685_v57 }
 0x366   :  { %v727_v40 = vpop.f32.mrb[2].mxu1 }
 0x367   :  { %v728_v41 = vadd.f32 %v727_v40, %v660_v21  ;;  %v1153_v42 = vpop.f32.mrb[3].mxu1 }
 0x369   :  { %v731_v44 = vmax.f32 %v728_v41, 0.0 }
 0x36b   :  { %1187 = vmatmul.mubr.f32.vlgmr.msra.gmra.mrb[4].mxu1 %v731_v44 }
 0x36c   :  { %1469 = vmatpush3.bf16.msra.mxu1 %v1468_v43  ;;  %1221 = vmatprep.mubr.msk.f32.mxu1 %vm1686_vm0, %v1687_v6  ;;  %v1492_v6 = vpack.c.bf16 %v912_v5, %v911_v4 }
 0x36d   :  { %1470 = vmatprep.subr.bf16.mxu1 %v1685_v57 }
 0x36e   :  { %1493 = vmatpush3.bf16.msra.mxu0 %v1492_v6 }
 0x36f   :  { %1494 = vmatprep.subr.bf16.mxu0 %v1685_v57 }
 0x370   :  { %1472 = vmatpush3.bf16.msra.mxu1 %v1471_v50 }
 0x371   :  { %1473 = vmatprep.subr.bf16.mxu1 %v1685_v57 }
 0x372   :  { %1496 = vmatpush3.bf16.msra.mxu0 %v1495_v32 }
 0x373   :  { %1497 = vmatprep.subr.bf16.mxu0 %v1685_v57 }
 0x374   :  { %1475 = vmatpush3.bf16.msra.mxu1 %v1474_v53 }
 0x375   :  { %1476 = vmatprep.subr.bf16.mxu1 %v1685_v57 }
 0x376   :  { %1499 = vmatpush3.bf16.msra.mxu0 %v1498_v10 }
 0x377   :  { %1500 = vmatprep.subr.bf16.mxu0 %v1685_v57 }
 0x378   :  { %1478 = vmatpush3.bf16.msra.mxu1 %v1477_v39 }
 0x379   :  { %1479 = vmatprep.subr.bf16.mxu1 %v1685_v57 }
 0x37a   :  { %1502 = vmatpush3.bf16.msra.mxu0 %v1501_v18 }
 0x37b   :  { %1503 = vmatprep.subr.bf16.mxu0 %v1685_v57 }
 0x37c   :  { %1481 = vmatpush3.bf16.msra.mxu1 %v1480_v58 }
 0x37d   :  { %1482 = vmatprep.subr.bf16.mxu1 %v1685_v57 }
 0x37e   :  { %1505 = vmatpush3.bf16.msra.mxu0 %v1504_v49 }
 0x37f   :  { %1506 = vmatprep.subr.bf16.mxu0 %v1685_v57 }
 0x380   :  { %1484 = vmatpush3.bf16.msra.mxu1 %v1483_v61 }
 0x381   :  { %1485 = vmatprep.subr.bf16.mxu1 %v1685_v57 }
 0x382   :  { %1508 = vmatpush3.bf16.msra.mxu0 %v1507_v17 }
 0x383   :  { %1509 = vmatprep.subr.bf16.mxu0 %v1685_v57 }
 0x384   :  { %1487 = vmatpush3.bf16.msra.mxu1 %v1486_v27 }
 0x385   :  { %1488 = vmatprep.subr.bf16.mxu1 %v1685_v57 }
 0x386   :  { %1511 = vmatpush3.bf16.msra.mxu0 %v1510_v24 }
 0x387   :  { %1512 = vmatprep.subr.bf16.mxu0 %v1685_v57 }
 0x388   :  { %1490 = vmatpush3.bf16.msra.mxu1 %v1489_v1 }
 0x38a   :  { %1514 = vmatpush3.bf16.msra.mxu0 %v1513_v30 }
 0x43e   :  { %v816_v3 = vpop.f32.mrb[4].mxu1 }
 0x43f   :  { %v817_v14 = vadd.f32 %v816_v3, %v749_v25  ;;  %v1188_v26 = vpop.f32.mrb[5].mxu1 }
 0x441   :  { %v820_v48 = vmax.f32 %v817_v14, 0.0 }
 0x443   :  { %1222 = vmatmul.mubr.f32.vlgmr.msra.gmra.mrb[6].mxu1 %v820_v48 }
 0x516   :  { %v905_v33 = vpop.f32.mrb[6].mxu1 }
 0x517   :  { %v906_v34 = vadd.f32 %v905_v33, %v838_v31  ;;  %v1223_v57 = vpop.f32.mrb[7].mxu1 }
 0x519   :  { %v909_v35 = vmax.f32 %v906_v34, 0.0 }
 0x51b   :  { %1257 = vmatmul.mubr.f32.vlgmr.msra.gmra.mrb[2].mxu0 %v909_v35 }
 0x5ee   :  { %v994_v21 = vpop.f32.mrb[2].mxu0 }
 0x5ef   :  { %v995_v2 = vadd.f32 %v994_v21, %v927_v11  ;;  %v1258_v36 = vpop.f32.mrb[3].mxu0 }
 0x5f1   :  { %998 = vst [vmem:[#allocation11] sm:$0xff] %v995_v2 }
 0x5f2   :  { %1655 = shalt.err (!%p1652_p2)
}
 0x5f3   :  { %s1656_s26 = scalar_lea.hbm %s1967_s6, 128 }
 0x5f4   :  { %p1657_p3 = scmp.ne.s32.totalorder %s1967_s6, %s1656_s26  ;;  %p1660_p4 = scmp.lt.u32.totalorder %s1656_s26, %s1967_s6 }
 0x5f6   :  { %p1662_p5 = pnand %p1660_p4, %p1657_p3 }
 0x5f8   :  { %1665 = shalt.err (!%p1662_p5)
}
 0x5f9   :  { %1008 = dma.vmem_to_hbm [thread:$0]  %s1006_s0, 128, %s1967_s6, [#allocation4]  }
 0x5fa   :  { %1672 = dma.done.wait [#allocation4], 128  }
 0x5fb   :  { %1673 = vsyncadd [#allocation4], 4294967168 }
 0x5fc   :  { %1012 = vsyncpa [#allocation3], 1 }
 0x5fd   :  { %1013 = vsyncpa [#allocation6], 1 }
 0x5fe   :  { %1014 = vsyncpa [#allocation9], 1 }
 0x5ff   :  { %1015 = vsyncpa [#allocation4], 1 }

</bundles_post_ra>
